<compile_context>
chip_gen: v6e
topology: v6e:2x2x1
jax: 0.10.0
libtpu: 0.0.40
codegen_flags: <defaults>
</compile_context>

<pallas_src>
import jax
import jax.numpy as jnp
from jax.experimental import pallas as pl
from jax.experimental.pallas import tpu as pltpu


def _round_up(v, m):
    return (v + m - 1) // m * m


def _two_layer_kernel(x_ref, w1_ref, b1_ref, w2_ref, b2_ref, o_ref):
    # Cast x to the MXU compute dtype in-kernel (no separate XLA pass over x).
    x = x_ref[...].astype(w1_ref.dtype)
    # First linear: (tm, D_in) @ (D_in, H_pad), f32 accumulation on the MXU.
    h = jnp.dot(x, w1_ref[...], preferred_element_type=jnp.float32)
    # Bias add + clamp(min=0) == ReLU, in f32 on the VPU.
    h = jnp.maximum(h + b1_ref[...], 0.0)
    # Second linear: (tm, H_pad) @ (H_pad, D_out_pad).
    y = jnp.dot(h.astype(w2_ref.dtype), w2_ref[...],
                preferred_element_type=jnp.float32)
    o_ref[...] = (y + b2_ref[...]).astype(o_ref.dtype)


def make_two_layer_net(w1, b1, w2, b2, *, tm_max=512, min_row_tiles=2,
                       compute_dtype=jnp.bfloat16, out_dtype=None,
                       vmem_limit_bytes=32 * 1024 * 1024):
    """Build a jitted fused forward pass for TwoLayerNet.

    Parameters are in PyTorch nn.Linear layout:
      w1: (H, D_in), b1: (H,), w2: (D_out, H), b2: (D_out,)

    All parameter prep (transpose, lane-padding to 128, dtype cast) happens
    once here; the jitted hot path is a single pallas_call plus a column slice.
    """
    H, D_in = w1.shape
    D_out = w2.shape[0]
    H_pad = _round_up(H, 128)
    D_out_pad = _round_up(D_out, 128)

    # Pre-transposed, zero-padded, pre-cast parameters (one-time cost).
    w1_t = jnp.zeros((D_in, H_pad), compute_dtype).at[:, :H].set(
        w1.T.astype(compute_dtype))
    b1_p = jnp.zeros((1, H_pad), jnp.float32).at[:, :H].set(
        b1.astype(jnp.float32))
    w2_t = jnp.zeros((H_pad, D_out_pad), compute_dtype).at[:H, :D_out].set(
        w2.T.astype(compute_dtype))
    b2_p = jnp.zeros((1, D_out_pad), jnp.float32).at[:, :D_out].set(
        b2.astype(jnp.float32))

    @jax.jit
    def forward(x):
        N, d_in = x.shape
        assert d_in == D_in, "input feature dim mismatch"
        o_dtype = x.dtype if out_dtype is None else out_dtype

        # Row-tile selection:
        #  * >= min_row_tiles tiles so a v7x megacore (2 TCs) shards the
        #    "parallel" axis (one extra grid step on single-TC v5e/v6e),
        #  * each tile <= tm_max and 8-aligned,
        #  * prefer tm_eff * n_tiles == N so no row padding / row slice.
        n_tiles = max(min_row_tiles, pl.cdiv(N, tm_max), 1)
        tm_eff = _round_up(pl.cdiv(N, n_tiles), 8)
        n_pad = tm_eff * n_tiles

        if n_pad == N:
            x_in = x  # no per-call copy of x
        else:
            # Rare path (N not evenly splittable into 8-aligned tiles): pad
            # rows with zeros. Kept explicit so no undefined data is ever
            # read by the kernel.
            x_in = jnp.zeros((n_pad, D_in), x.dtype).at[:N].set(x)

        # VMEM budget check sized against the tightest generation (v7x:
        # 64 MiB physical / 32 MiB scoped). Weights counted double-buffered
        # to be conservative even though their index_map is constant.
        weight_bytes = 2 * (w1_t.nbytes + b1_p.nbytes + w2_t.nbytes + b2_p.nbytes)
        io_tile_bytes = (2 * tm_eff * D_in * x.dtype.itemsize
                         + 2 * tm_eff * D_out_pad * jnp.dtype(o_dtype).itemsize)
        interm_bytes = tm_eff * (H_pad + D_out_pad) * 4  # f32 h and y
        assert weight_bytes + io_tile_bytes + interm_bytes <= vmem_limit_bytes, (
            "VMEM budget exceeded: chunk H (arbitrary grid axis + f32 "
            "accumulator) or shrink tm_max for this generation.")

        flops = 2 * n_pad * D_in * H_pad + 2 * n_pad * H_pad * D_out_pad
        bytes_accessed = (
            x_in.size * x_in.dtype.itemsize
            + w1_t.nbytes + b1_p.nbytes + w2_t.nbytes + b2_p.nbytes
            + n_pad * D_out_pad * jnp.dtype(o_dtype).itemsize)

        y_pad = pl.pallas_call(
            _two_layer_kernel,
            out_shape=jax.ShapeDtypeStruct((n_pad, D_out_pad), o_dtype),
            grid=(n_tiles,),
            in_specs=[
                # x tile marches over rows (original dtype, cast in-kernel).
                pl.BlockSpec((tm_eff, D_in), lambda i: (i, 0)),
                # Weights / biases: constant block index -> VMEM-resident
                # across all grid steps (fetched once, not per tile).
                pl.BlockSpec((D_in, H_pad), lambda i: (0, 0)),
                pl.BlockSpec((1, H_pad), lambda i: (0, 0)),
                pl.BlockSpec((H_pad, D_out_pad), lambda i: (0, 0)),
                pl.BlockSpec((1, D_out_pad), lambda i: (0, 0)),
            ],
            out_specs=pl.BlockSpec((tm_eff, D_out_pad), lambda i: (i, 0)),
            compiler_params=pltpu.CompilerParams(
                # Independent row tiles -> megacore sharding on v7x.
                dimension_semantics=("parallel",),
                vmem_limit_bytes=vmem_limit_bytes,
            ),
            cost_estimate=pl.CostEstimate(
                flops=flops, transcendentals=0,
                bytes_accessed=bytes_accessed),
        )(x_in, w1_t, b1_p, w2_t, b2_p)

        # Strip lane padding; strip row padding only if any was added.
        return y_pad[:, :D_out] if n_pad == N else y_pad[:N, :D_out]

    return forward


if __name__ == "__main__":
    # Small shapes consistent with TwoLayerNet(D_in, H, D_out) on x:(N, D_in).
    # H and D_out deliberately non-multiples of 128 to exercise lane padding.
    N, D_in, H, D_out = 256, 64, 100, 10

    key = jax.random.PRNGKey(0)
    kx, kw1, kb1, kw2, kb2 = jax.random.split(key, 5)

    x = jax.random.normal(kx, (N, D_in), dtype=jnp.float32)
    # PyTorch Linear stores weight as (out_features, in_features).
    w1 = jax.random.normal(kw1, (H, D_in), dtype=jnp.float32) * 0.1
    b1 = jax.random.normal(kb1, (H,), dtype=jnp.float32) * 0.1
    w2 = jax.random.normal(kw2, (D_out, H), dtype=jnp.float32) * 0.1
    b2 = jax.random.normal(kb2, (D_out,), dtype=jnp.float32) * 0.1

    # Pure-JAX reference, same math as the PyTorch forward.
    y_ref = jnp.maximum(x @ w1.T + b1, 0.0) @ w2.T + b2

    # 1) Exact-semantics path: f32 compute end to end (main, copy-free path:
    #    N = 256 splits exactly into two 128-row tiles).
    fwd_f32 = make_two_layer_net(w1, b1, w2, b2, compute_dtype=jnp.float32)
    y_f32 = jax.block_until_ready(fwd_f32(x))
    assert y_f32.shape == (N, D_out)
    assert jnp.allclose(y_f32, y_ref, atol=1e-4, rtol=1e-4), "f32 mismatch"

    # 1b) Non-divisible batch -> exercises the explicit row-padding fallback.
    x_odd = x[:100]
    y_odd = jax.block_until_ready(fwd_f32(x_odd))
    assert jnp.allclose(y_odd, y_ref[:100], atol=1e-4, rtol=1e-4), "ragged mismatch"

    # 2) MXU-friendly bf16 path (perf default on v6e/v7x): check against a
    #    same-precision reference (tight) and the f32 reference (loose).
    fwd_bf16 = make_two_layer_net(w1, b1, w2, b2, compute_dtype=jnp.bfloat16)
    y_bf16 = jax.block_until_ready(fwd_bf16(x))
    xb = x.astype(jnp.bfloat16)
    h_b = jnp.maximum(
        jnp.dot(xb, w1.T.astype(jnp.bfloat16),
                preferred_element_type=jnp.float32) + b1, 0.0)
    y_ref_b = jnp.dot(h_b.astype(jnp.bfloat16), w2.T.astype(jnp.bfloat16),
                      preferred_element_type=jnp.float32) + b2
    assert jnp.allclose(y_bf16, y_ref_b, atol=1e-3, rtol=1e-3), "bf16 mismatch"
    assert jnp.allclose(y_bf16, y_ref, atol=1e-1, rtol=1e-1), "bf16 drift"

    print("KERNEL_OK")
</pallas_src>

<mosaic_0001>
module attributes {stable_mosaic.version = 11 : i64} {
  func.func @_two_layer_kernel(%arg0: i32, %arg1: memref<128x64xf32, #tpu.memory_space<vmem>>, %arg2: memref<64x128xf32, #tpu.memory_space<vmem>>, %arg3: memref<1x128xf32, #tpu.memory_space<vmem>>, %arg4: memref<128x128xf32, #tpu.memory_space<vmem>>, %arg5: memref<1x128xf32, #tpu.memory_space<vmem>>, %arg6: memref<128x128xf32, #tpu.memory_space<vmem>>) attributes {dimension_semantics = [#tpu.dimension_semantics<parallel>], iteration_bounds = array<i64: 2>, scalar_prefetch = 0 : i64, scratch_operands = 0 : i64, tpu.core_type = #tpu.core_type<tc>, window_params = [{transform_indices = @transform_0, window_bounds = array<i64: 128, 64>}, {pipeline_mode = #tpu.pipeline_mode<synchronous>, transform_indices = @transform_1, window_bounds = array<i64: 64, 128>}, {pipeline_mode = #tpu.pipeline_mode<synchronous>, transform_indices = @transform_2, window_bounds = array<i64: 1, 128>}, {pipeline_mode = #tpu.pipeline_mode<synchronous>, transform_indices = @transform_3, window_bounds = array<i64: 128, 128>}, {pipeline_mode = #tpu.pipeline_mode<synchronous>, transform_indices = @transform_4, window_bounds = array<i64: 1, 128>}, {transform_indices = @transform_5, window_bounds = array<i64: 128, 128>}]} {
    %c0 = arith.constant 0 : index
    %c0_0 = arith.constant 0 : index
    %0 = vector.load %arg1[%c0, %c0_0] : memref<128x64xf32, #tpu.memory_space<vmem>>, vector<128x64xf32>
    %c0_1 = arith.constant 0 : index
    %c0_2 = arith.constant 0 : index
    %1 = vector.load %arg2[%c0_1, %c0_2] : memref<64x128xf32, #tpu.memory_space<vmem>>, vector<64x128xf32>
    %cst = arith.constant dense<0.000000e+00> : vector<128x128xf32>
    %2 = tpu.matmul %0, %1, %cst {dimension_numbers = #tpu.dot_dimension_numbers<[1], [0], [0], [1], [0, 0, 1, 1], [], []>} : vector<128x64xf32>, vector<64x128xf32>, vector<128x128xf32> -> vector<128x128xf32>
    %c0_3 = arith.constant 0 : index
    %c0_4 = arith.constant 0 : index
    %3 = vector.load %arg3[%c0_3, %c0_4] : memref<1x128xf32, #tpu.memory_space<vmem>>, vector<1x128xf32>
    %4 = vector.broadcast %3 : vector<1x128xf32> to vector<128x128xf32>
    %5 = arith.addf %2, %4 : vector<128x128xf32>
    %cst_5 = arith.constant 0.000000e+00 : f32
    %6 = vector.broadcast %cst_5 : f32 to vector<128x128xf32>
    %7 = arith.maximumf %5, %6 : vector<128x128xf32>
    %c0_6 = arith.constant 0 : index
    %c0_7 = arith.constant 0 : index
    %8 = vector.load %arg4[%c0_6, %c0_7] : memref<128x128xf32, #tpu.memory_space<vmem>>, vector<128x128xf32>
    %cst_8 = arith.constant dense<0.000000e+00> : vector<128x128xf32>
    %9 = tpu.matmul %7, %8, %cst_8 {dimension_numbers = #tpu.dot_dimension_numbers<[1], [0], [0], [1], [0, 0, 1, 1], [], []>} : vector<128x128xf32>, vector<128x128xf32>, vector<128x128xf32> -> vector<128x128xf32>
    %c0_9 = arith.constant 0 : index
    %c0_10 = arith.constant 0 : index
    %10 = vector.load %arg5[%c0_9, %c0_10] : memref<1x128xf32, #tpu.memory_space<vmem>>, vector<1x128xf32>
    %11 = vector.broadcast %10 : vector<1x128xf32> to vector<128x128xf32>
    %12 = arith.addf %9, %11 : vector<128x128xf32>
    %c0_11 = arith.constant 0 : index
    %c0_12 = arith.constant 0 : index
    %13 = vector.load %arg6[%c0_11, %c0_12] : memref<128x128xf32, #tpu.memory_space<vmem>>, vector<128x128xf32>
    tpu.vector_store %arg6[%c0_11, %c0_12], %12 {strides = array<i32>} : memref<128x128xf32, #tpu.memory_space<vmem>>, vector<128x128xf32>,
    return
  }
  func.func @transform_0(%arg0: i32) -> (i32, i32) {
    %c0_i32 = arith.constant 0 : i32
    %c0_i32_0 = arith.constant 0 : i32
    return %arg0, %c0_i32 : i32, i32
  }
  func.func @transform_1(%arg0: i32) -> (i32, i32) {
    %c0_i32 = arith.constant 0 : i32
    %c0_i32_0 = arith.constant 0 : i32
    %c0_i32_1 = arith.constant 0 : i32
    return %c0_i32, %c0_i32_0 : i32, i32
  }
  func.func @transform_2(%arg0: i32) -> (i32, i32) {
    %c0_i32 = arith.constant 0 : i32
    %c0_i32_0 = arith.constant 0 : i32
    %c0_i32_1 = arith.constant 0 : i32
    return %c0_i32, %c0_i32_0 : i32, i32
  }
  func.func @transform_3(%arg0: i32) -> (i32, i32) {
    %c0_i32 = arith.constant 0 : i32
    %c0_i32_0 = arith.constant 0 : i32
    %c0_i32_1 = arith.constant 0 : i32
    return %c0_i32, %c0_i32_0 : i32, i32
  }
  func.func @transform_4(%arg0: i32) -> (i32, i32) {
    %c0_i32 = arith.constant 0 : i32
    %c0_i32_0 = arith.constant 0 : i32
    %c0_i32_1 = arith.constant 0 : i32
    return %c0_i32, %c0_i32_0 : i32, i32
  }
  func.func @transform_5(%arg0: i32) -> (i32, i32) {
    %c0_i32 = arith.constant 0 : i32
    %c0_i32_0 = arith.constant 0 : i32
    return %arg0, %c0_i32 : i32, i32
  }
}

</mosaic_0001>

<bundles_post_ra>
// kernel: forward.1
= control target key start
LH: loop header
LB: loop body
LE: loop exit
PB: predicated region body
PF: predicated region fallthrough
CT: control target
= control target key end

     0   :  { %s968_s18 = smov 0   ;;  %s1122_s0 = inlined_call_operand.vmem [shape: f32[256,64], index: 0, kind: input, shape index: {}]   ;;  %s1123_s1 = inlined_call_operand.vmem [shape: f32[64,128], index: 1, kind: input, shape index: {}]   ;;  %s1124_s2 = inlined_call_operand.vmem [shape: f32[1,128], index: 2, kind: input, shape index: {}]   ;;  %s1125_s3 = inlined_call_operand.vmem [shape: f32[128,128], index: 3, kind: input, shape index: {}]   ;;  %s1126_s4 = inlined_call_operand.vmem [shape: f32[1,128], index: 4, kind: input, shape index: {}]   ;;  %s1127_s5 = inlined_call_operand.vmem [shape: f32[256,128], index: 5, kind: output, shape index: {}]  }
   0x1 LB: > { %s709_s19 = sadd.s32 4294967295, %s936_s18   ;;  %p713_p0 = scmp.ge.s32.totalorder %s936_s18, 1  ;;  %s936_s18 = sphi %s968_s18, %s15_s18  }
   0x2   : > { %p188_p1 = scmp.lt.s32.totalorder %s936_s18, 3 }
   0x4   : > { %p189_p2 = pnand %p713_p0, %p188_p1 }
   0x5   : > { %s714_s24 = sshll.u32 (!%p189_p2), %s709_s19, 4 }
   0x6   : > { %192 = sbr.rel (%p189_p2) target bundleno = 454 (0x1c6), region = 40  ;;  %p217_p3 = scmp.lt.s32.totalorder (!%p189_p2), %s714_s24, 31 }
   0xb   : > { %v251_v0 = vld [vmem:[%s1123_s1 + $0x38] sm:$0xff]  ;;  %v250_v1 = vld [vmem:[%s1123_s1 + $0x30] sm:$0xff]  ;;  %v249_v2 = vld [vmem:[%s1123_s1 + $0x28] sm:$0xff]  ;;  %s1129_s24 = smov (!%p217_p3, %s714_s24), 31  ;;  %vm259_vm0 = vcmask 523264  }
   0xc   : > { %794 = vmatprep.subr.mxu0 %v251_v0  ;;  %v484_v3 = vld [vmem:[%s1125_s3 + $0x78] sm:$0xff]  ;;  %v248_v4 = vld [vmem:[%s1123_s1 + $0x20] sm:$0xff]  ;;  %v483_v5 = vld [vmem:[%s1125_s3 + $0x70] sm:$0xff]  ;;  %s715_s8 = sshll.u32 %s1129_s24, 3 }
   0xd   : > { %795 = vmatpush3.msra.mxu0 %v251_v0  ;;  %890 = vmatprep.subr.mxu1 %v484_v3  ;;  %v247_v6 = vld [vmem:[%s1123_s1 + $0x18] sm:$0xff]  ;;  %s1005_s13 = scalar_lea.vmem %s1122_s0, %s715_s8  ;;  %v482_v7 = vld [vmem:[%s1125_s3 + $0x68] sm:$0xff]  ;;  %v246_v9 = vld [vmem:[%s1123_s1 + $0x10] sm:$0xff]  ;;  %s1101_s10 = scalar_lea.vmem %s1127_s5, %s715_s8 }
   0xe   : > { %796 = vmatprep.subr.mxu0 %v250_v1  ;;  %906 = vmatpush3.msra.mxu1 %v484_v3  ;;  %v228_v8 = vld [vmem:[%s1005_s13] sm:$0xff]  ;;  %v245_v11 = vld [vmem:[%s1123_s1 + $0x8] sm:$0xff]  ;;  %v480_v12 = vld [vmem:[%s1125_s3 + $0x58] sm:$0xff] }
   0xf   : > { %797 = vmatpush3.msra.mxu0 %v250_v1  ;;  %891 = vmatprep.subr.mxu1 %v483_v5  ;;  %v481_v10 = vld [vmem:[%s1125_s3 + $0x60] sm:$0xff]  ;;  %v479_v14 = vld [vmem:[%s1125_s3 + $0x50] sm:$0xff]  ;;  %v229_v15 = vld [vmem:[%s1005_s13 + $0x8] sm:$0xff] }
  0x10   : > { %798 = vmatprep.subr.mxu0 %v249_v2  ;;  %907 = vmatpush3.msra.mxu1 %v483_v5  ;;  %v244_v13 = vld [vmem:[%s1123_s1] sm:$0xff]  ;;  %v230_v16 = vld [vmem:[%s1005_s13 + $0x10] sm:$0xff]  ;;  %v478_v17 = vld [vmem:[%s1125_s3 + $0x48] sm:$0xff] }
  0x11   : > { %799 = vmatpush3.msra.mxu0 %v249_v2  ;;  %892 = vmatprep.subr.mxu1 %v482_v7  ;;  %v231_v18 = vld [vmem:[%s1005_s13 + $0x18] sm:$0xff]  ;;  %v232_v19 = vld [vmem:[%s1005_s13 + $0x20] sm:$0xff]  ;;  %v233_v21 = vld [vmem:[%s1005_s13 + $0x28] sm:$0xff] }
  0x12   : > { %800 = vmatprep.subr.mxu0 %v248_v4  ;;  %810 = vmatprep.mubr.msk.f32.mxu0 %vm259_vm0, %v228_v8  ;;  %v477_v20 = vld [vmem:[%s1125_s3 + $0x40] sm:$0xff]  ;;  %v234_v22 = vld [vmem:[%s1005_s13 + $0x30] sm:$0xff]  ;;  %v476_v23 = vld [vmem:[%s1125_s3 + $0x38] sm:$0xff] }
  0x13   : > { %801 = vmatpush3.msra.mxu0 %v248_v4  ;;  %908 = vmatpush3.msra.mxu1 %v482_v7  ;;  %v235_v24 = vld [vmem:[%s1005_s13 + $0x38] sm:$0xff]  ;;  %v236_v25 = vld [vmem:[%s1005_s13 + $0x40] sm:$0xff]  ;;  %v475_v26 = vld [vmem:[%s1125_s3 + $0x30] sm:$0xff] }
  0x14   : > { %802 = vmatprep.subr.mxu0 %v247_v6  ;;  %893 = vmatprep.subr.mxu1 %v481_v10  ;;  %v237_v27 = vld [vmem:[%s1005_s13 + $0x48] sm:$0xff]  ;;  %v238_v28 = vld [vmem:[%s1005_s13 + $0x50] sm:$0xff]  ;;  %v239_v30 = vld [vmem:[%s1005_s13 + $0x58] sm:$0xff] }
  0x15   : > { %803 = vmatpush3.msra.mxu0 %v247_v6  ;;  %909 = vmatpush3.msra.mxu1 %v481_v10  ;;  %v474_v29 = vld [vmem:[%s1125_s3 + $0x28] sm:$0xff]  ;;  %v240_v31 = vld [vmem:[%s1005_s13 + $0x60] sm:$0xff]  ;;  %v242_v34 = vld [vmem:[%s1005_s13 + $0x70] sm:$0xff] }
  0x16   : > { %804 = vmatprep.subr.mxu0 %v246_v9  ;;  %894 = vmatprep.subr.mxu1 %v480_v12  ;;  %v473_v32 = vld [vmem:[%s1125_s3 + $0x20] sm:$0xff]  ;;  %v241_v33 = vld [vmem:[%s1005_s13 + $0x68] sm:$0xff]  ;;  %v243_v35 = vld [vmem:[%s1005_s13 + $0x78] sm:$0xff] }
  0x17   : > { %805 = vmatpush3.msra.mxu0 %v246_v9  ;;  %910 = vmatpush3.msra.mxu1 %v480_v12  ;;  %v472_v36 = vld [vmem:[%s1125_s3 + $0x18] sm:$0xff]  ;;  %v471_v37 = vld [vmem:[%s1125_s3 + $0x10] sm:$0xff]  ;;  %v470_v38 = vld [vmem:[%s1125_s3 + $0x8] sm:$0xff] }
  0x18   : > { %806 = vmatprep.subr.mxu0 %v245_v11  ;;  %895 = vmatprep.subr.mxu1 %v479_v14  ;;  %v469_v39 = vld [vmem:[%s1125_s3] sm:$0xff] }
  0x19   : > { %807 = vmatpush3.msra.mxu0 %v245_v11  ;;  %911 = vmatpush3.msra.mxu1 %v479_v14  ;;  %v718_v40 = vld [vmem:[%s1124_s2] ss:$0 sm:$0xff] }
  0x1a   : > { %808 = vmatprep.subr.mxu0 %v244_v13  ;;  %896 = vmatprep.subr.mxu1 %v478_v17 }
  0x1b   : > { %809 = vmatpush3.msra.mxu0 %v244_v13  ;;  %912 = vmatpush3.msra.mxu1 %v478_v17 }
  0x1c   : > { %811 = vmatmul.mubr.msk.f32.vlgmr.msra.gmra.mxu0 %vm259_vm0, %v229_v15  ;;  %834 = vmatprep.subr.mxu0 %v484_v3 }
  0x1d   : > { %813 = vmatprep.mubr.msk.f32.mxu0 %vm259_vm0, %v230_v16  ;;  %835 = vmatpush3.msra.mxu0 %v484_v3 }
  0x1e   : > { %836 = vmatprep.subr.mxu0 %v483_v5  ;;  %897 = vmatprep.subr.mxu1 %v477_v20 }
  0x1f   : > { %837 = vmatpush3.msra.mxu0 %v483_v5  ;;  %913 = vmatpush3.msra.mxu1 %v477_v20 }
  0x20   : > { %814 = vmatmul.mubr.msk.f32.gmra.mxu0 %vm259_vm0, %v231_v18  ;;  %838 = vmatprep.subr.mxu0 %v482_v7 }
  0x21   : > { %816 = vmatprep.mubr.msk.f32.mxu0 %vm259_vm0, %v232_v19  ;;  %839 = vmatpush3.msra.mxu0 %v482_v7 }
  0x22   : > { %840 = vmatprep.subr.mxu0 %v481_v10  ;;  %898 = vmatprep.subr.mxu1 %v476_v23 }
  0x23   : > { %841 = vmatpush3.msra.mxu0 %v481_v10  ;;  %914 = vmatpush3.msra.mxu1 %v476_v23 }
  0x24   : > { %817 = vmatmul.mubr.msk.f32.gmra.mxu0 %vm259_vm0, %v233_v21  ;;  %842 = vmatprep.subr.mxu0 %v480_v12 }
  0x25   : > { %819 = vmatprep.mubr.msk.f32.mxu0 %vm259_vm0, %v234_v22  ;;  %843 = vmatpush3.msra.mxu0 %v480_v12 }
  0x26   : > { %844 = vmatprep.subr.mxu0 %v479_v14  ;;  %899 = vmatprep.subr.mxu1 %v475_v26 }
  0x27   : > { %845 = vmatpush3.msra.mxu0 %v479_v14  ;;  %915 = vmatpush3.msra.mxu1 %v475_v26 }
  0x28   : > { %820 = vmatmul.mubr.msk.f32.gmra.mxu0 %vm259_vm0, %v235_v24  ;;  %846 = vmatprep.subr.mxu0 %v478_v17 }
  0x29   : > { %822 = vmatprep.mubr.msk.f32.mxu0 %vm259_vm0, %v236_v25  ;;  %847 = vmatpush3.msra.mxu0 %v478_v17  ;;  %v735_v25 = vld [vmem:[%s1126_s4] ss:$0 sm:$0xff] }
  0x2a   : > { %848 = vmatprep.subr.mxu0 %v477_v20  ;;  %900 = vmatprep.subr.mxu1 %v474_v29 }
  0x2b   : > { %849 = vmatpush3.msra.mxu0 %v477_v20  ;;  %916 = vmatpush3.msra.mxu1 %v474_v29 }
  0x2c   : > { %823 = vmatmul.mubr.msk.f32.gmra.mxu0 %vm259_vm0, %v237_v27  ;;  %850 = vmatprep.subr.mxu0 %v476_v23 }
  0x2d   : > { %825 = vmatprep.mubr.msk.f32.mxu0 %vm259_vm0, %v238_v28  ;;  %851 = vmatpush3.msra.mxu0 %v476_v23 }
  0x2e   : > { %852 = vmatprep.subr.mxu0 %v475_v26  ;;  %901 = vmatprep.subr.mxu1 %v473_v32 }
  0x2f   : > { %853 = vmatpush3.msra.mxu0 %v475_v26  ;;  %917 = vmatpush3.msra.mxu1 %v473_v32 }
  0x30   : > { %826 = vmatmul.mubr.msk.f32.gmra.mxu0 %vm259_vm0, %v239_v30  ;;  %854 = vmatprep.subr.mxu0 %v474_v29 }
  0x31   : > { %828 = vmatprep.mubr.msk.f32.mxu0 %vm259_vm0, %v240_v31  ;;  %855 = vmatpush3.msra.mxu0 %v474_v29 }
  0x32   : > { %856 = vmatprep.subr.mxu0 %v473_v32  ;;  %902 = vmatprep.subr.mxu1 %v472_v36 }
  0x33   : > { %857 = vmatpush3.msra.mxu0 %v473_v32  ;;  %918 = vmatpush3.msra.mxu1 %v472_v36 }
  0x34   : > { %829 = vmatmul.mubr.msk.f32.gmra.mxu0 %vm259_vm0, %v241_v33  ;;  %858 = vmatprep.subr.mxu0 %v472_v36 }
  0x35   : > { %831 = vmatprep.mubr.msk.f32.mxu0 %vm259_vm0, %v242_v34  ;;  %859 = vmatpush3.msra.mxu0 %v472_v36 }
  0x36   : > { %860 = vmatprep.subr.mxu0 %v471_v37  ;;  %903 = vmatprep.subr.mxu1 %v471_v37 }
  0x37   : > { %861 = vmatpush3.msra.mxu0 %v471_v37  ;;  %919 = vmatpush3.msra.mxu1 %v471_v37 }
  0x38   : > { %832 = vmatmul.mubr.msk.f32.gmra.mxu0 %vm259_vm0, %v243_v35  ;;  %862 = vmatprep.subr.mxu0 %v470_v38 }
  0x39   : > { %904 = vmatprep.subr.mxu1 %v470_v38  ;;  %863 = vmatpush3.msra.mxu0 %v470_v38 }
  0x3a   : > { %920 = vmatpush3.msra.mxu1 %v470_v38  ;;  %864 = vmatprep.subr.mxu0 %v469_v39 }
  0x3b   : > { %905 = vmatprep.subr.mxu1 %v469_v39  ;;  %865 = vmatpush3.msra.mxu0 %v469_v39 }
  0x3c   : > { %921 = vmatpush3.msra.mxu1 %v469_v39 }
  0xdc   : > { %v812_v41 = vpop.f32.mrf.mxu0 }
  0xdd   : > { %v380_v42 = vadd.f32 %v812_v41, %v718_v40 }
  0xde   : > { %v374_v43 = vpop.f32.mrf.mxu0 }
  0xdf   : > { %v375_v44 = vadd.f32 %v718_v40, %v374_v43  ;;  %v454_v47 = vmax.f32 %v380_v42, 0.0 }
  0xe0   : > { %v815_v45 = vpop.f32.mrf.mxu0 }
  0xe1   : > { %v453_v46 = vmax.f32 %v375_v44, 0.0  ;;  %v390_v48 = vadd.f32 %v815_v45, %v718_v40 }
  0xe2   : > { %v384_v49 = vpop.f32.mrf.mxu0 }
  0xe3   : > { %v385_v50 = vadd.f32 %v718_v40, %v384_v49  ;;  %866 = vmatprep.mubr.f32.mxu0 %v453_v46  ;;  %v456_v53 = vmax.f32 %v390_v48, 0.0 }
  0xe4   : > { %v818_v51 = vpop.f32.mrf.mxu0  ;;  %867 = vmatmul.mubr.f32.vlgmr.msra.gmra.mxu0 %v454_v47 }
  0xe5   : > { %v455_v52 = vmax.f32 %v385_v50, 0.0  ;;  %v400_v54 = vadd.f32 %v818_v51, %v718_v40 }
  0xe6   : > { %v394_v55 = vpop.f32.mrf.mxu0 }
  0xe7   : > { %869 = vmatprep.mubr.f32.mxu0 %v455_v52  ;;  %v395_v56 = vadd.f32 %v718_v40, %v394_v55  ;;  %v458_v59 = vmax.f32 %v400_v54, 0.0 }
  0xe8   : > { %v821_v57 = vpop.f32.mrf.mxu0  ;;  %870 = vmatmul.mubr.f32.gmra.mxu0 %v456_v53 }
  0xe9   : > { %v457_v58 = vmax.f32 %v395_v56, 0.0  ;;  %v410_v60 = vadd.f32 %v821_v57, %v718_v40 }
  0xea   : > { %v404_v61 = vpop.f32.mrf.mxu0 }
  0xeb   : > { %v405_v62 = vadd.f32 %v718_v40, %v404_v61  ;;  %872 = vmatprep.mubr.f32.mxu1 %v457_v58  ;;  %v460_v1 = vmax.f32 %v410_v60, 0.0 }
  0xec   : > { %v824_v63 = vpop.f32.mrf.mxu0  ;;  %873 = vmatmul.mubr.f32.vlgmr.msra.gmra.mxu1 %v458_v59 }
  0xed   : > { %v459_v0 = vmax.f32 %v405_v62, 0.0  ;;  %v420_v2 = vadd.f32 %v824_v63, %v718_v40 }
  0xee   : > { %v414_v3 = vpop.f32.mrf.mxu0 }
  0xef   : > { %v415_v4 = vadd.f32 %v718_v40, %v414_v3  ;;  %875 = vmatprep.mubr.f32.mxu1 %v459_v0  ;;  %v462_v7 = vmax.f32 %v420_v2, 0.0 }
  0xf0   : > { %v827_v5 = vpop.f32.mrf.mxu0  ;;  %876 = vmatmul.mubr.f32.gmra.mxu1 %v460_v1 }
  0xf1   : > { %v461_v6 = vmax.f32 %v415_v4, 0.0  ;;  %v430_v8 = vadd.f32 %v827_v5, %v718_v40 }
  0xf2   : > { %v424_v9 = vpop.f32.mrf.mxu0 }
  0xf3   : > { %v425_v10 = vadd.f32 %v718_v40, %v424_v9  ;;  %878 = vmatprep.mubr.f32.mxu1 %v461_v6  ;;  %v464_v13 = vmax.f32 %v430_v8, 0.0 }
  0xf4   : > { %v830_v11 = vpop.f32.mrf.mxu0  ;;  %879 = vmatmul.mubr.f32.gmra.mxu1 %v462_v7 }
  0xf5   : > { %v463_v12 = vmax.f32 %v425_v10, 0.0  ;;  %v440_v14 = vadd.f32 %v830_v11, %v718_v40 }
  0xf6   : > { %v434_v15 = vpop.f32.mrf.mxu0 }
  0xf7   : > { %v435_v16 = vadd.f32 %v718_v40, %v434_v15  ;;  %881 = vmatprep.mubr.f32.mxu1 %v463_v12  ;;  %v466_v19 = vmax.f32 %v440_v14, 0.0 }
  0xf8   : > { %v833_v17 = vpop.f32.mrf.mxu0  ;;  %882 = vmatmul.mubr.f32.gmra.mxu1 %v464_v13 }
  0xf9   : > { %v465_v18 = vmax.f32 %v435_v16, 0.0  ;;  %v450_v20 = vadd.f32 %v833_v17, %v718_v40 }
  0xfa   : > { %v444_v21 = vpop.f32.mrf.mxu0 }
  0xfb   : > { %v445_v22 = vadd.f32 %v718_v40, %v444_v21  ;;  %884 = vmatprep.mubr.f32.mxu1 %v465_v18  ;;  %v468_v24 = vmax.f32 %v450_v20, 0.0 }
  0xfc   : > { %885 = vmatmul.mubr.f32.gmra.mxu1 %v466_v19 }
  0xfd   : > { %v467_v23 = vmax.f32 %v445_v22, 0.0 }
  0xff   : > { %887 = vmatprep.mubr.f32.mxu1 %v467_v23 }
 0x100   : > { %888 = vmatmul.mubr.f32.gmra.mxu1 %v468_v24 }
 0x1a4   : > { %v868_v26 = vpop.f32.mrf.mxu0 }
 0x1a5   : > { %v564_v27 = vadd.f32 %v868_v26, %v735_v25 }
 0x1a6   : > { %v558_v28 = vpop.f32.mrf.mxu0 }
 0x1a7   : > { %638 = vst [vmem:[%s1101_s10 + $0x8] sm:$0xff] %v564_v27  ;;  %v559_v29 = vadd.f32 %v735_v25, %v558_v28 }
 0x1a8   : > { %v871_v30 = vpop.f32.mrf.mxu0 }
 0x1a9   : > { %637 = vst [vmem:[%s1101_s10] sm:$0xff] %v559_v29  ;;  %v574_v31 = vadd.f32 %v871_v30, %v735_v25 }
 0x1aa   : > { %v568_v32 = vpop.f32.mrf.mxu0 }
 0x1ab   : > { %640 = vst [vmem:[%s1101_s10 + $0x18] sm:$0xff] %v574_v31  ;;  %v569_v33 = vadd.f32 %v735_v25, %v568_v32 }
 0x1ac   : > { %v874_v34 = vpop.f32.mrf.mxu1 }
 0x1ad   : > { %639 = vst [vmem:[%s1101_s10 + $0x10] sm:$0xff] %v569_v33  ;;  %v584_v35 = vadd.f32 %v874_v34, %v735_v25 }
 0x1ae   : > { %v578_v36 = vpop.f32.mrf.mxu1 }
 0x1af   : > { %642 = vst [vmem:[%s1101_s10 + $0x28] sm:$0xff] %v584_v35  ;;  %v579_v37 = vadd.f32 %v735_v25, %v578_v36 }
 0x1b0   : > { %v877_v38 = vpop.f32.mrf.mxu1 }
 0x1b1   : > { %641 = vst [vmem:[%s1101_s10 + $0x20] sm:$0xff] %v579_v37  ;;  %v594_v39 = vadd.f32 %v877_v38, %v735_v25 }
 0x1b2   : > { %v588_v40 = vpop.f32.mrf.mxu1 }
 0x1b3   : > { %644 = vst [vmem:[%s1101_s10 + $0x38] sm:$0xff] %v594_v39  ;;  %v589_v41 = vadd.f32 %v735_v25, %v588_v40 }
 0x1b4   : > { %v880_v42 = vpop.f32.mrf.mxu1 }
 0x1b5   : > { %643 = vst [vmem:[%s1101_s10 + $0x30] sm:$0xff] %v589_v41  ;;  %v604_v43 = vadd.f32 %v880_v42, %v735_v25 }
 0x1b6   : > { %v598_v44 = vpop.f32.mrf.mxu1 }
 0x1b7   : > { %646 = vst [vmem:[%s1101_s10 + $0x48] sm:$0xff] %v604_v43  ;;  %v599_v45 = vadd.f32 %v735_v25, %v598_v44 }
 0x1b8   : > { %v883_v46 = vpop.f32.mrf.mxu1 }
 0x1b9   : > { %645 = vst [vmem:[%s1101_s10 + $0x40] sm:$0xff] %v599_v45  ;;  %v614_v47 = vadd.f32 %v883_v46, %v735_v25 }
 0x1ba   : > { %v608_v48 = vpop.f32.mrf.mxu1 }
 0x1bb   : > { %648 = vst [vmem:[%s1101_s10 + $0x58] sm:$0xff] %v614_v47  ;;  %v609_v49 = vadd.f32 %v735_v25, %v608_v48 }
 0x1bc   : > { %v886_v50 = vpop.f32.mrf.mxu1 }
 0x1bd   : > { %647 = vst [vmem:[%s1101_s10 + $0x50] sm:$0xff] %v609_v49  ;;  %v624_v51 = vadd.f32 %v886_v50, %v735_v25 }
 0x1be   : > { %v618_v52 = vpop.f32.mrf.mxu1 }
 0x1bf   : > { %650 = vst [vmem:[%s1101_s10 + $0x68] sm:$0xff] %v624_v51  ;;  %v619_v53 = vadd.f32 %v735_v25, %v618_v52 }
 0x1c0   : > { %v889_v54 = vpop.f32.mrf.mxu1 }
 0x1c1   : > { %649 = vst [vmem:[%s1101_s10 + $0x60] sm:$0xff] %v619_v53  ;;  %v634_v55 = vadd.f32 %v889_v54, %v735_v25 }
 0x1c2   : > { %v628_v56 = vpop.f32.mrf.mxu1 }
 0x1c3   : > { %652 = vst [vmem:[%s1101_s10 + $0x78] sm:$0xff] %v634_v55  ;;  %v629_v57 = vadd.f32 %v735_v25, %v628_v56 }
 0x1c5   : > { %651 = vst [vmem:[%s1101_s10 + $0x70] sm:$0xff] %v629_v57 }
 0x1c6 PF: > { %s15_s18 = sadd.s32 1, %s936_s18  }
 0x1c7   : > { %p12_p4 = scmp.ge.s32.totalorder %s15_s18, 4  }
 0x1c9   :  { %14 = sbr.rel (!%p12_p4) target bundleno = 1 (0x1), region = 70 }

</bundles_post_ra>
